<compile_context>
chip_gen: v6e
topology: v6e:2x2x1
jax: 0.10.0
libtpu: 0.0.40
codegen_flags: <defaults>
</compile_context>

<pallas_src>
import functools

import jax
import jax.numpy as jnp
from jax.experimental import pallas as pl
from jax.experimental.pallas import tpu as pltpu


def _conv1d_kernel(x_ref, w_ref, o_ref, *, L):
    # x_ref: (Mt, H)     rows are (batch, position) pairs, batch-major,
    #                    Mt is a whole number of sequences (Mt = Bt * L)
    # w_ref: (3*H, Hout) rows ordered [tap x[l-1] ; tap x[l] ; tap x[l+1]]
    # o_ref: (Mt, Hout)
    x = x_ref[...]
    Mt = x.shape[0]

    # Position-within-sequence of every flattened row (L is a static int).
    pos = jax.lax.broadcasted_iota(jnp.int32, x.shape, 0) % L

    # x[l-1]: rotate rows down by one (XLU), zero rows at sequence start.
    x_prev = jnp.where(pos == 0, jnp.zeros_like(x),
                       pltpu.roll(x, shift=1, axis=0))
    # x[l+1]: rotate rows up by one (shift = -1 mod Mt), zero rows at sequence end.
    x_next = jnp.where(pos == L - 1, jnp.zeros_like(x),
                       pltpu.roll(x, shift=Mt - 1, axis=0))

    # im2col window: (Mt, 3H); single MXU matmul with f32 accumulation.
    xcat = jnp.concatenate([x_prev, x, x_next], axis=1)
    out = jnp.dot(xcat, w_ref[...], preferred_element_type=jnp.float32)
    o_ref[...] = out.astype(o_ref.dtype)


def _pick_batch_tile(B, L, max_rows=1024):
    """Largest divisor Bt of B with Bt*L <= max_rows rows per grid step and a
    sublane-aligned block when the grid has more than one step."""
    for bt in range(B, 0, -1):
        if B % bt != 0:
            continue
        rows = bt * L
        if rows > max_rows:
            continue
        if bt != B and rows % 8 != 0:
            continue
        return bt
    return B  # fall back to one full-array block


def cnn_forward(x, weight):
    """x: (B, L, H) float32; weight: torch layout (H_out, H_in, 3)."""
    B, L, H = x.shape
    Hout = weight.shape[0]

    # im2col weight: rows [0:H] multiply x[l-1], [H:2H] -> x[l], [2H:3H] -> x[l+1]
    w_cat = jnp.transpose(weight, (2, 1, 0)).reshape(3 * H, Hout)

    # Fold (B, L) -> M.  Contiguous reshape: no data movement.
    x2d = x.reshape(B * L, H)

    Bt = _pick_batch_tile(B, L)
    Mt = Bt * L
    grid = (B // Bt,)

    out2d = pl.pallas_call(
        functools.partial(_conv1d_kernel, L=L),
        out_shape=jax.ShapeDtypeStruct((B * L, Hout), x.dtype),
        grid_spec=pltpu.PrefetchScalarGridSpec(
            num_scalar_prefetch=0,
            grid=grid,
            in_specs=[
                pl.BlockSpec((Mt, H), lambda i: (i, 0)),
                pl.BlockSpec((3 * H, Hout), lambda i: (0, 0)),  # resident weight
            ],
            out_specs=pl.BlockSpec((Mt, Hout), lambda i: (i, 0)),
        ),
        compiler_params=pltpu.CompilerParams(
            dimension_semantics=("parallel",)),
    )(x2d, w_cat)

    return out2d.reshape(B, L, Hout)


def _reference(x, weight):
    # pure-JAX reference of Conv1d(k=3, pad=1, bias=False) in (B, L, H) layout
    L = x.shape[1]
    x_pad = jnp.pad(x, ((0, 0), (1, 1), (0, 0)))
    out = jnp.zeros((x.shape[0], L, weight.shape[0]), jnp.float32)
    for k in range(3):
        out = out + jnp.einsum('blh,oh->blo',
                               x_pad[:, k:k + L, :], weight[:, :, k],
                               precision=jax.lax.Precision.HIGHEST)
    return out.astype(x.dtype)


if __name__ == "__main__":
    B, L, H = 2, 8, 32          # batch=2, seq=8, hidden_size=32
    key = jax.random.PRNGKey(0)
    kx, kw = jax.random.split(key)
    x = jax.random.normal(kx, (B, L, H), dtype=jnp.float32)
    # deterministic synthetic Conv1d weight, torch layout (H_out, H_in, kernel=3)
    fan_in = H * 3
    bound = 1.0 / (fan_in ** 0.5)
    weight = jax.random.uniform(kw, (H, H, 3), dtype=jnp.float32,
                                minval=-bound, maxval=bound)

    y = cnn_forward(x, weight)
    y = jax.block_until_ready(y)

    y_ref = _reference(x, weight)
    assert y.shape == (B, L, H)
    assert jnp.allclose(y, y_ref, atol=1e-5, rtol=1e-5)
    print("KERNEL_OK")
</pallas_src>

<mosaic_0001>
module attributes {stable_mosaic.version = 11 : i64} {
  func.func @_conv1d_kernel(%arg0: i32, %arg1: memref<16x32xf32, #tpu.memory_space<vmem>>, %arg2: memref<96x32xf32, #tpu.memory_space<vmem>>, %arg3: memref<16x32xf32, #tpu.memory_space<vmem>>) attributes {dimension_semantics = [#tpu.dimension_semantics<parallel>], iteration_bounds = array<i64: 1>, scalar_prefetch = 0 : i64, scratch_operands = 0 : i64, tpu.core_type = #tpu.core_type<tc>, window_params = [{transform_indices = @transform_0, window_bounds = array<i64: 16, 32>}, {pipeline_mode = #tpu.pipeline_mode<synchronous>, transform_indices = @transform_1, window_bounds = array<i64: 96, 32>}, {transform_indices = @transform_2, window_bounds = array<i64: 16, 32>}]} {
    %c0 = arith.constant 0 : index
    %c0_0 = arith.constant 0 : index
    %0 = vector.load %arg1[%c0, %c0_0] : memref<16x32xf32, #tpu.memory_space<vmem>>, vector<16x32xf32>
    %1 = tpu.iota {dimensions = array<i32: 0>} : vector<16x32xi32>
    %c8_i32 = arith.constant 8 : i32
    %c0_i32 = arith.constant 0 : i32
    %2 = arith.cmpi eq, %c8_i32, %c0_i32 : i32
    %c1_i32 = arith.constant 1 : i32
    %3 = arith.select %2, %c1_i32, %c8_i32 : i32
    %4 = vector.broadcast %3 : i32 to vector<16x32xi32>
    %5 = arith.remsi %1, %4 : vector<16x32xi32>
    %c0_i32_1 = arith.constant 0 : i32
    %6 = vector.broadcast %c0_i32_1 : i32 to vector<16x32xi32>
    %7 = arith.cmpi ne, %5, %6 : vector<16x32xi32>
    %c0_i32_2 = arith.constant 0 : i32
    %8 = vector.broadcast %c0_i32_2 : i32 to vector<16x32xi32>
    %9 = arith.cmpi slt, %5, %8 : vector<16x32xi32>
    %c0_i32_3 = arith.constant 0 : i32
    %10 = arith.cmpi slt, %3, %c0_i32_3 : i32
    %11 = vector.broadcast %10 : i1 to vector<16x32xi1>
    %12 = vector.broadcast %11 : vector<16x32xi1> to vector<16x32xi1>
    %13 = arith.xori %9, %12 : vector<16x32xi1>
    %14 = arith.andi %13, %7 : vector<16x32xi1>
    %15 = vector.broadcast %3 : i32 to vector<16x32xi32>
    %16 = arith.addi %5, %15 : vector<16x32xi32>
    %17 = arith.select %14, %16, %5 : vector<16x32xi1>, vector<16x32xi32>
    %c0_i32_4 = arith.constant 0 : i32
    %18 = vector.broadcast %c0_i32_4 : i32 to vector<16x32xi32>
    %19 = arith.cmpi eq, %17, %18 : vector<16x32xi32>
    %cst = arith.constant 0.000000e+00 : f32
    %20 = vector.broadcast %cst : f32 to vector<16x32xf32>
    %c1_i32_5 = arith.constant 1 : i32
    %21 = tpu.dynamic_rotate %0 by %c1_i32_5 dim 0 : vector<16x32xf32>, i32 -> vector<16x32xf32>
    %22 = arith.select %19, %20, %21 : vector<16x32xi1>, vector<16x32xf32>
    %c7_i32 = arith.constant 7 : i32
    %23 = vector.broadcast %c7_i32 : i32 to vector<16x32xi32>
    %24 = arith.cmpi eq, %17, %23 : vector<16x32xi32>
    %cst_6 = arith.constant 0.000000e+00 : f32
    %25 = vector.broadcast %cst_6 : f32 to vector<16x32xf32>
    %c15_i32 = arith.constant 15 : i32
    %26 = tpu.dynamic_rotate %0 by %c15_i32 dim 0 : vector<16x32xf32>, i32 -> vector<16x32xf32>
    %27 = arith.select %24, %25, %26 : vector<16x32xi1>, vector<16x32xf32>
    %28 = tpu.concatenate %22, %0, %27 in 1 : vector<16x32xf32>, vector<16x32xf32>, vector<16x32xf32> -> vector<16x96xf32>
    %c0_7 = arith.constant 0 : index
    %c0_8 = arith.constant 0 : index
    %29 = vector.load %arg2[%c0_7, %c0_8] : memref<96x32xf32, #tpu.memory_space<vmem>>, vector<96x32xf32>
    %cst_9 = arith.constant dense<0.000000e+00> : vector<16x32xf32>
    %30 = tpu.matmul %28, %29, %cst_9 {dimension_numbers = #tpu.dot_dimension_numbers<[1], [0], [0], [1], [0, 0, 1, 1], [], []>} : vector<16x96xf32>, vector<96x32xf32>, vector<16x32xf32> -> vector<16x32xf32>
    %c0_10 = arith.constant 0 : index
    %c0_11 = arith.constant 0 : index
    %31 = vector.load %arg3[%c0_10, %c0_11] : memref<16x32xf32, #tpu.memory_space<vmem>>, vector<16x32xf32>
    tpu.vector_store %arg3[%c0_10, %c0_11], %30 {strides = array<i32>} : memref<16x32xf32, #tpu.memory_space<vmem>>, vector<16x32xf32>,
    return
  }
  func.func @transform_0(%arg0: i32) -> (i32, i32) {
    %c0_i32 = arith.constant 0 : i32
    %c0_i32_0 = arith.constant 0 : i32
    return %arg0, %c0_i32 : i32, i32
  }
  func.func @transform_1(%arg0: i32) -> (i32, i32) {
    %c0_i32 = arith.constant 0 : i32
    %c0_i32_0 = arith.constant 0 : i32
    %c0_i32_1 = arith.constant 0 : i32
    return %c0_i32, %c0_i32_0 : i32, i32
  }
  func.func @transform_2(%arg0: i32) -> (i32, i32) {
    %c0_i32 = arith.constant 0 : i32
    %c0_i32_0 = arith.constant 0 : i32
    return %arg0, %c0_i32 : i32, i32
  }
}

</mosaic_0001>

<bundles_post_ra>
// kernel: tpu_custom_call.1
= control target key start
LH: loop header
LB: loop body
LE: loop exit
PB: predicated region body
PF: predicated region fallthrough
CT: control target
= control target key end

     0   :  { %v14_v2 = vlaneseq  ;;  %s263_s15 = smov 32   ;;  %s344_s0 = inlined_call_operand.vmem [shape: f32[16,32], index: 0, kind: input, shape index: {}]   ;;  %s345_s1 = inlined_call_operand.vmem [shape: f32[96,32], index: 1, kind: input, shape index: {}]   ;;  %s346_s2 = inlined_call_operand.hbm [shape: f32[16,32], index: 2, kind: output, shape index: {}]  }
   0x1   :  { %v12_v0 = vld [vmem:[%s344_s0] sm:$0xff]  ;;  %v13_v1 = vld [vmem:[%s344_s0 + $0x8] sm:$0xff]  ;;  %v92_v3 = vld [vmem:[%s345_s1 + $0x58] sm:$0xff] }
   0x2   :  { %61 = vrot.lane.b32.xlu0 %v12_v0, %s263_s15  ;;  %v43_v4 = vrot.slane %v12_v0, 7  ;;  %v52_v5 = vrot.slane %v12_v0, 1  ;;  %v53_v6 = vrot.slane %v13_v1, 1  ;;  %209 = vmatprep.subr.mxu0 %v92_v3  ;;  %v91_v7 = vld [vmem:[%s345_s1 + $0x50] sm:$0xff]  ;;  %v15_v8 = vshrl.u32 %v14_v2, 7  ;;  %v90_v9 = vld [vmem:[%s345_s1 + $0x48] sm:$0xff] }
   0x3   :  { %210 = vmatpush3.msra.mxu0 %v92_v3  ;;  %v44_v10 = vrot.slane %v13_v1, 7  ;;  %v89_v13 = vld [vmem:[%s345_s1 + $0x40] sm:$0xff] }
   0x4   :  { %211 = vmatprep.subr.mxu0 %v91_v7  ;;  %v21_v11 = vand.u32 7, %v15_v8  ;;  %vm54_vm0 = vcmp.lt.s32.totalorder %v15_v8, 7  ;;  %v16_v12 = vadd.s32 8, %v15_v8  ;;  %vm45_vm1 = vcmp.lt.s32.totalorder %v15_v8, 1 }
   0x5   :  { %212 = vmatpush3.msra.mxu0 %v91_v7  ;;  %v55_v14 = vsel %vm54_vm0, %v52_v5, %v53_v6  ;;  %v56_v15 = vsel %vm54_vm0, %v53_v6, %v52_v5  ;;  %v47_v16 = vsel %vm45_vm1, %v44_v10, %v43_v4 }
   0x6   :  { %63 = vrot.lane.b32.xlu0 %v13_v1, %s263_s15  ;;  %213 = vmatprep.subr.mxu0 %v90_v9 }
   0x7   :  { %7 = vsyncpa [#allocation3], 0  ;;  %vm50_vm2 = vcmp.eq.s32.totalorder %v21_v11, 7  ;;  %v28_v17 = vand.u32 7, %v16_v12  ;;  %214 = vmatpush3.msra.mxu0 %v90_v9  ;;  %v88_v18 = vld [vmem:[%s345_s1 + $0x38] sm:$0xff]  ;;  %vm304_vm3 = vcmp.eq.s32.totalorder %v21_v11, 0  ;;  %v46_v20 = vsel %vm45_vm1, %v43_v4, %v44_v10 }
   0x8   :  { %v57_v21 = vsel %vm50_vm2, 0.0, %v55_v14  ;;  %215 = vmatprep.subr.mxu0 %v89_v13  ;;  %v48_v22 = vsel %vm304_vm3, 0.0, %v47_v16  ;;  %s264_s23 = smov 64   ;;  %v87_v23 = vld [vmem:[%s345_s1 + $0x30] sm:$0xff]  ;;  %v86_v27 = vld [vmem:[%s345_s1 + $0x28] sm:$0xff]  ;;  %v85_v28 = vld [vmem:[%s345_s1 + $0x20] sm:$0xff] }
   0x9   :  { %69 = vrot.lane.b32.xlu1 %v57_v21, %s264_s23  ;;  %vm51_vm4 = vcmp.eq.s32.totalorder %v28_v17, 7  ;;  %216 = vmatpush3.msra.mxu0 %v89_v13  ;;  %vm313_vm5 = vcmp.eq.s32.totalorder %v28_v17, 0  ;;  %v84_v29 = vld [vmem:[%s345_s1 + $0x18] sm:$0xff]  ;;  %v83_v30 = vld [vmem:[%s345_s1 + $0x10] sm:$0xff]  ;;  %v82_v31 = vld [vmem:[%s345_s1 + $0x8] sm:$0xff]  ;;  %vm75_vm6 = vcmask 261120  }
   0xa   :  { %v58_v25 = vsel %vm51_vm4, 0.0, %v56_v15  ;;  %217 = vmatprep.subr.mxu0 %v88_v18  ;;  %v49_v26 = vsel %vm313_vm5, 0.0, %v46_v20  ;;  %v81_v32 = vld [vmem:[%s345_s1] sm:$0xff]  ;;  %vm78_vm7 = vcmask 523264   ;;  %vm93_vm8 = vcmask 785408   ;;  %s265_s1 = smov [#allocation2]  }
   0xb   :  { %218 = vmatpush3.msra.mxu0 %v88_v18  ;;  %s182_s10 = sshll.u32 %s265_s1, 4  ;;  %s183_s10 = int_to_ptr.vmem [resolvable:$true] %s182_s10 }
   0xc   :  { %219 = vmatprep.subr.mxu0 %v87_v23  ;;  %s241_s11 = scalar_lea.vmem %s183_s10, 256  ;;  %p246_p1 = scmp.lt.s32.totalorder %s183_s10, %s183_s10 }
   0xd   :  { %71 = vrot.lane.b32.xlu1 %v58_v25, %s264_s23  ;;  %220 = vmatpush3.msra.mxu0 %v87_v23  ;;  %p242_p0 = scmp.ne.s32.totalorder %s183_s10, %s241_s11  ;;  %p247_p2 = scmp.lt.s32.totalorder %s241_s11, %s241_s11 }
   0xe   :  { %221 = vmatprep.subr.mxu0 %v86_v27 }
   0xf   :  { %222 = vmatpush3.msra.mxu0 %v86_v27  ;;  %p248_p3 = por %p247_p2, %p246_p1 }
  0x10   :  { %223 = vmatprep.subr.mxu0 %v85_v28 }
  0x11   :  { %224 = vmatpush3.msra.mxu0 %v85_v28  ;;  %p249_p4 = pnand %p248_p3, %p242_p0 }
  0x12   :  { %225 = vmatprep.subr.mxu0 %v84_v29 }
  0x13   :  { %226 = vmatpush3.msra.mxu0 %v84_v29 }
  0x14   :  { %227 = vmatprep.subr.mxu0 %v83_v30 }
  0x15   :  { %228 = vmatpush3.msra.mxu0 %v83_v30 }
  0x16   :  { %229 = vmatprep.subr.mxu0 %v82_v31 }
  0x17   :  { %230 = vmatpush3.msra.mxu0 %v82_v31 }
  0x18   :  { %231 = vmatprep.subr.mxu0 %v81_v32 }
  0x19   :  { %232 = vmatpush3.msra.mxu0 %v81_v32 }
  0x74   :  { %v62_v33 = vpop.permute.xlu0 %61 }
  0x75   :  { %v76_v34 = vsel %vm75_vm6, %v48_v22, %v62_v33 }
  0x78   :  { %v64_v35 = vpop.permute.xlu0 %63 }
  0x79   :  { %v77_v38 = vsel %vm75_vm6, %v49_v26, %v64_v35 }
  0x7b   :  { %v70_v36 = vpop.permute.xlu1 %69 }
  0x7c   :  { %v79_v37 = vsel %vm78_vm7, %v76_v34, %v70_v36 }
  0x7d   :  { %233 = vmatprep.mubr.msk.f32.mxu0 %vm93_vm8, %v79_v37 }
  0x7f   :  { %v72_v39 = vpop.permute.xlu1 %71 }
  0x80   :  { %v80_v40 = vsel %vm78_vm7, %v77_v38, %v72_v39 }
  0x81   :  { %234 = vmatmul.mubr.msk.f32.vlgmr.msra.gmra.mxu0 %vm93_vm8, %v80_v40 }
 0x141   :  { %v235_v41 = vpop.f32.mrf.mxu0 }
 0x142   :  { %176 = vst.msk [vmem:[#allocation2 + $0x8] sm:$0xff] %vm75_vm6, %v235_v41 }
 0x143   :  { %v166_v42 = vpop.f32.mrf.mxu0 }
 0x144   :  { %175 = vst.msk [vmem:[#allocation2] sm:$0xff] %vm75_vm6, %v166_v42 }
 0x145   :  { %252 = shalt.err (!%p249_p4)
}
 0x146   :  { %s266_s12 = smov 128   ;;  %s267_s13 = smov 8  }
 0x147   :  { %188 = dma.vmem_to_hbm [thread:$0]  %s183_s10, 256, %s346_s2, [#allocation3], %s266_s12, %s266_s12, %s267_s13  }
 0x148   :  { %261 = dma.done.wait [#allocation3], 256  }
 0x149   :  { %262 = vsyncadd [#allocation3], 4294967040 }
 0x14a   :  { %192 = vsyncpa [#allocation3], 1 }

</bundles_post_ra>
